<compile_context>
chip_gen: v7x
topology: tpu7x:2x2x1
jax: 0.10.0
libtpu: 0.0.40
codegen_flags: <defaults>
</compile_context>

<pallas_src>
import math
from functools import partial

import jax
import jax.numpy as jnp
from jax.experimental import pallas as pl
from jax.experimental.pallas import tpu as pltpu


# ----------------------------------------------------------------------------
# Buffer setup (glue, plain JAX) — mirrors PositionalEncoding.__init__
# ----------------------------------------------------------------------------
def make_pe_table(d_model: int, max_len: int = 5000):
    """sin/cos table in the torch buffer layout [max_len, 1, d_model], float32."""
    position = jnp.arange(0, max_len, dtype=jnp.float32)[:, None]           # [max_len, 1]
    div_term = jnp.exp(
        jnp.arange(0, d_model, 2, dtype=jnp.float32) * (-math.log(10000.0) / d_model)
    )                                                                        # [d_model/2]
    ang = position * div_term                                                # [max_len, d_model/2]
    pe = jnp.zeros((max_len, d_model), dtype=jnp.float32)
    pe = pe.at[:, 0::2].set(jnp.sin(ang))
    pe = pe.at[:, 1::2].set(jnp.cos(ang))
    return pe[:, None, :]                                                    # [max_len, 1, d_model]


# ----------------------------------------------------------------------------
# Kernels.  In-kernel data view:
#   x / out blocks : [tile_s, tile_b * D]   (batch collapsed into the lane axis
#                                            -> wide, unmasked stores)
#   pe block       : [tile_s, D]            (tiny; broadcast over batch IN-VREG,
#                                            never duplicated in HBM)
# ----------------------------------------------------------------------------
def _pe_add_kernel(x_ref, pe_ref, o_ref, *, reps):
    pe = pe_ref[...].astype(jnp.float32)               # [tile_s, D]
    if reps > 1:
        pe = jnp.tile(pe, (1, reps))                   # in-vreg batch broadcast
    y = x_ref[...].astype(jnp.float32) + pe            # add in f32, cast once
    o_ref[...] = y.astype(o_ref.dtype)


def _pe_add_dropout_kernel(seed_ref, x_ref, pe_ref, o_ref, *,
                           reps, keep_threshold, inv_keep):
    # Fused PE add + inverted dropout (scale kept values by 1/(1-p)).
    # The random stream cannot bit-match torch's dropout; semantics do.
    # Multi-word seed (user seed + both grid coords) decorrelates adjacent
    # steps and keeps every grid step order-independent ("parallel" axes).
    pltpu.prng_seed(seed_ref[0], pl.program_id(0), pl.program_id(1))
    pe = pe_ref[...].astype(jnp.float32)
    if reps > 1:
        pe = jnp.tile(pe, (1, reps))
    y = x_ref[...].astype(jnp.float32) + pe
    bits = pltpu.bitcast(pltpu.prng_random_bits(y.shape), jnp.uint32)
    keep = bits >= jnp.uint32(keep_threshold)          # P(keep) = 1 - p
    o_ref[...] = jnp.where(keep, y * inv_keep, 0.0).astype(o_ref.dtype)


# ----------------------------------------------------------------------------
# Tiling / VMEM heuristics
# ----------------------------------------------------------------------------
def _round_up(v, m):
    return -(-v // m) * m


def _default_target_block_bytes():
    """~2 MiB blocks are safe on every generation (v7x: 64 MiB physical VMEM);
    on 128-MiB-VMEM chips (v5e/v6e) larger blocks amortize the ~0.35 us/step
    overhead better, so bump to 4 MiB when the chip advertises that much."""
    try:
        vmem = pltpu.get_tpu_info().vmem_capacity_bytes
        return (4 << 20) if vmem >= (96 << 20) else (2 << 20)
    except Exception:
        return 2 << 20


def _choose_tiles(S, B, D, itemsize, target_block_bytes, min_steps=8):
    """Pick (tile_s, tile_b, pack).

    * tile_s is a multiple of the dtype sublane pack (f32:8, bf16:16, i8:32).
    * the lane width tile_b*D is either the full B*D or a multiple of 128
      aligned to whole batch entries (so the in-kernel pe broadcast lines up
      and output stores are unmasked).
    * blocks target <= target_block_bytes; total grid aims for >= min_steps so
      v7x's two TensorCores each get several pipelined steps.
    """
    pack = max(8, 32 // itemsize)
    row_bytes = B * D * itemsize

    # Lane-axis (batch) split — only needed when a pack-row full-width block
    # would overshoot the byte target (large B*D).
    tile_b = B
    if pack * row_bytes > target_block_bytes and B > 1:
        lane_mult = 128 // math.gcd(D, 128)          # tile_b*D must be 128-lane aligned
        cand = (target_block_bytes // max(pack * D * itemsize, 1)) // lane_mult * lane_mult
        cand = max(cand, lane_mult)
        if cand < B:
            tile_b = cand
        # else: cannot split the collapsed (B*D) lane axis cleanly.
        # TODO(synk): D-axis split for the B==1 / huge-D corner case.

    nbt = pl.cdiv(B, tile_b)
    if S <= pack:
        tile_s = pack                                 # one (possibly partial) block
    else:
        row_b = tile_b * D * itemsize
        by_bytes = max(pack, (target_block_bytes // max(row_b, 1)) // pack * pack)
        needed_ns = max(1, -(-min_steps // nbt))
        by_steps = max(pack, (S // needed_ns) // pack * pack)
        tile_s = min(by_bytes, by_steps)
    return tile_s, tile_b, pack


# ----------------------------------------------------------------------------
# Wrapper — PositionalEncoding.forward
# ----------------------------------------------------------------------------
def positional_encoding(x, pe, *, dropout_p=0.1, training=False, seed=0,
                        target_block_bytes=None):
    """y = dropout(x + pe[:S]);  x: [S, B, D], pe: [max_len, 1, D] -> [S, B, D]."""
    S, B, D = x.shape
    max_len = pe.shape[0]
    if pe.shape != (max_len, 1, D):
        raise ValueError(f"pe must have shape [max_len, 1, {D}], got {pe.shape}")
    if S > max_len:
        raise ValueError("sequence length exceeds the positional-encoding table")

    itemsize = jnp.dtype(x.dtype).itemsize
    N = B * D
    if target_block_bytes is None:
        target_block_bytes = _default_target_block_bytes()
    tile_s, tile_b, pack = _choose_tiles(S, B, D, itemsize, target_block_bytes)
    tile_n = tile_b * D
    grid = (pl.cdiv(S, tile_s), pl.cdiv(B, tile_b))

    # Free layout plumbing (metadata-only reshapes, NO extra HBM pass):
    #  * collapse (B, D) into the lane axis,
    #  * drop pe's singleton batch dim.  pe is NOT tiled over batch in HBM.
    x2 = x.reshape(S, N)
    pe2 = pe.reshape(max_len, D)

    # VMEM budget: double-buffered x/out/pe blocks, padded to (sublane, 128)
    # tiles, plus slack.  Never clamped below the actual footprint.
    xo_bytes = _round_up(tile_s, pack) * _round_up(tile_n, 128) * itemsize
    pe_bytes = _round_up(tile_s, 8) * _round_up(D, 128) * jnp.dtype(pe.dtype).itemsize
    footprint = 2 * (2 * xo_bytes + pe_bytes)
    vmem_limit = int(max(32 << 20, footprint + (8 << 20)))

    compiler_params = pltpu.CompilerParams(
        dimension_semantics=("parallel", "parallel"),   # megacore / v7x 2-TC sharding
        vmem_limit_bytes=vmem_limit,
    )
    out_shape = jax.ShapeDtypeStruct((S, N), x.dtype)

    train = bool(training) and float(dropout_p) > 0.0
    if not train:
        # Eval mode (PyTorch model.eval()): dropout is the identity.
        out2 = pl.pallas_call(
            partial(_pe_add_kernel, reps=tile_b),
            out_shape=out_shape,
            grid_spec=pltpu.PrefetchScalarGridSpec(
                num_scalar_prefetch=0,
                grid=grid,
                in_specs=[
                    pl.BlockSpec((tile_s, tile_n), lambda i, j: (i, j)),
                    pl.BlockSpec((tile_s, D), lambda i, j: (i, 0)),
                ],
                out_specs=pl.BlockSpec((tile_s, tile_n), lambda i, j: (i, j)),
            ),
            compiler_params=compiler_params,
        )(x2, pe2)
        return out2.reshape(S, B, D)

    # Training mode: fused PE add + inverted dropout (TPU hardware PRNG).
    p = float(dropout_p)
    if p >= 1.0:
        return jnp.zeros_like(x)                        # nn.Dropout(p=1) zeroes everything
    keep_threshold = min(int(round(p * 2.0 ** 32)), 2 ** 32 - 1)
    inv_keep = 1.0 / (1.0 - p)
    seed_arr = jnp.asarray([seed], dtype=jnp.int32)

    out2 = pl.pallas_call(
        partial(_pe_add_dropout_kernel, reps=tile_b,
                keep_threshold=keep_threshold, inv_keep=inv_keep),
        out_shape=out_shape,
        grid_spec=pltpu.PrefetchScalarGridSpec(
            num_scalar_prefetch=1,
            grid=grid,
            in_specs=[
                pl.BlockSpec((tile_s, tile_n), lambda i, j, s: (i, j)),
                pl.BlockSpec((tile_s, D), lambda i, j, s: (i, 0)),
            ],
            out_specs=pl.BlockSpec((tile_s, tile_n), lambda i, j, s: (i, j)),
        ),
        compiler_params=compiler_params,
    )(seed_arr, x2, pe2)
    return out2.reshape(S, B, D)


# ----------------------------------------------------------------------------
# Demo / checks
# ----------------------------------------------------------------------------
if __name__ == "__main__":
    d_model = 32
    seq_len = 16
    batch = 4
    p = 0.1

    key = jax.random.PRNGKey(0)
    x = jax.random.normal(key, (seq_len, batch, d_model), dtype=jnp.float32)
    pe = make_pe_table(d_model)                          # [5000, 1, 32] float32
    ref = x + pe[:seq_len]                               # pure-JAX reference

    # 1) eval mode (dropout == identity): matches PyTorch .eval() forward.
    out = jax.block_until_ready(positional_encoding(x, pe, dropout_p=p, training=False))
    assert out.shape == (seq_len, batch, d_model)
    assert jnp.allclose(out, ref, atol=1e-6, rtol=1e-6)

    # 2) bf16 activations: add done in f32 in-kernel, single cast on store.
    x_bf16 = x.astype(jnp.bfloat16)
    out_bf16 = jax.block_until_ready(positional_encoding(x_bf16, pe, training=False))
    assert out_bf16.dtype == jnp.bfloat16
    assert jnp.allclose(out_bf16.astype(jnp.float32), ref, atol=2e-2, rtol=2e-2)

    # 3) ragged sequence length (S not a multiple of 8): cdiv grid + masked edge block.
    x12 = jax.random.normal(jax.random.PRNGKey(1), (12, batch, d_model), jnp.float32)
    out12 = jax.block_until_ready(positional_encoding(x12, pe, training=False))
    assert jnp.allclose(out12, x12 + pe[:12], atol=1e-6, rtol=1e-6)

    # 4) force the batch/lane-axis grid split (large-N path) with a tiny block target.
    xb = jax.random.normal(jax.random.PRNGKey(2), (seq_len, 16, d_model), jnp.float32)
    outb = jax.block_until_ready(
        positional_encoding(xb, pe, training=False, target_block_bytes=4096))
    assert jnp.allclose(outb, xb + pe[:seq_len], atol=1e-6, rtol=1e-6)

    # 5) training mode (fused inverted dropout) needs the TPU hardware PRNG
    #    (pltpu.prng_seed has no lowering on non-TPU backends), so only run it
    #    when the default backend is a real TPU.
    if jax.default_backend() == "tpu":
        out_tr = jax.block_until_ready(
            positional_encoding(x, pe, dropout_p=p, training=True, seed=1234))
        scaled = ref / (1.0 - p)
        ok = jnp.isclose(out_tr, 0.0) | jnp.isclose(out_tr, scaled, atol=1e-5, rtol=1e-5)
        assert bool(jnp.all(ok)), "dropout outputs must be 0 or (x+pe)/(1-p)"

    print("KERNEL_OK")
</pallas_src>

<mosaic_0001>
module attributes {stable_mosaic.version = 11 : i64} {
  func.func @_pe_add_kernel(%arg0: i32, %arg1: i32, %arg2: memref<8x128xf32, #tpu.memory_space<vmem>>, %arg3: memref<8x32xf32, #tpu.memory_space<vmem>>, %arg4: memref<8x128xf32, #tpu.memory_space<vmem>>) attributes {dimension_semantics = [#tpu.dimension_semantics<parallel>, #tpu.dimension_semantics<parallel>], iteration_bounds = array<i64: 2, 1>, scalar_prefetch = 0 : i64, scratch_operands = 0 : i64, tpu.core_type = #tpu.core_type<tc>, window_params = [{transform_indices = @transform_0, window_bounds = array<i64: 8, 128>}, {transform_indices = @transform_1, window_bounds = array<i64: 8, 32>}, {transform_indices = @transform_2, window_bounds = array<i64: 8, 128>}]} {
    %c0 = arith.constant 0 : index
    %c0_0 = arith.constant 0 : index
    %0 = vector.load %arg3[%c0, %c0_0] : memref<8x32xf32, #tpu.memory_space<vmem>>, vector<8x32xf32>
    %1 = tpu.concatenate %0, %0, %0, %0 in 1 : vector<8x32xf32>, vector<8x32xf32>, vector<8x32xf32>, vector<8x32xf32> -> vector<8x128xf32>
    %c0_1 = arith.constant 0 : index
    %c0_2 = arith.constant 0 : index
    %2 = vector.load %arg2[%c0_1, %c0_2] : memref<8x128xf32, #tpu.memory_space<vmem>>, vector<8x128xf32>
    %3 = arith.addf %2, %1 : vector<8x128xf32>
    %c0_3 = arith.constant 0 : index
    %c0_4 = arith.constant 0 : index
    %4 = vector.load %arg4[%c0_3, %c0_4] : memref<8x128xf32, #tpu.memory_space<vmem>>, vector<8x128xf32>
    tpu.vector_store %arg4[%c0_3, %c0_4], %3 {strides = array<i32>} : memref<8x128xf32, #tpu.memory_space<vmem>>, vector<8x128xf32>,
    return
  }
  func.func @transform_0(%arg0: i32, %arg1: i32) -> (i32, i32) {
    %c0_i32 = arith.constant 0 : i32
    return %arg0, %arg1 : i32, i32
  }
  func.func @transform_1(%arg0: i32, %arg1: i32) -> (i32, i32) {
    %c0_i32 = arith.constant 0 : i32
    %c0_i32_0 = arith.constant 0 : i32
    return %arg0, %c0_i32 : i32, i32
  }
  func.func @transform_2(%arg0: i32, %arg1: i32) -> (i32, i32) {
    %c0_i32 = arith.constant 0 : i32
    return %arg0, %arg1 : i32, i32
  }
}

</mosaic_0001>

<bundles_post_ra>
// kernel: tpu_custom_call.1
= control target key start
LH: loop header
LB: loop body
LE: loop exit
PB: predicated region body
PF: predicated region fallthrough
CT: control target
= control target key end

     0   :  { %7 = vsyncpa [#allocation3], 0  ;;  %s585_s0 = inlined_call_operand.vmem [shape: f32[16,128], index: 0, kind: input, shape index: {}]   ;;  %s586_s1 = inlined_call_operand.vmem [shape: f32[5000,32], index: 1, kind: input, shape index: {}]   ;;  %s587_s2 = inlined_call_operand.hbm [shape: f32[16,128], index: 2, kind: output, shape index: {}]  }
   0x1   :  { %9 = vsyncpa [#allocation3 + $0x1], 0  ;;  %s468_s9 = smov 0   ;;  %s470_s10 = smov 0  }
   0x2   :  { %s472_s11 = smov 0   ;;  %s474_s12 = smov 0  }
   0x3   :  { %s476_s13 = smov 0   ;;  %s478_s14 = smov 0  }
   0x4 LB: > { %s299_s15 = sadd.s32 4294967295, %s447_s14   ;;  %s300_s16 = sadd.s32 4294967294, %s447_s14   ;;  %s447_s14 = sphi %s478_s14, %s15_s14   ;;  %s443_s13 = sphi %s476_s13, %s594_s13   ;;  %s439_s12 = sphi %s474_s12, %s593_s12   ;;  %s435_s11 = sphi %s472_s11, %s592_s11   ;;  %s431_s10 = sphi %s470_s10, %s591_s10   ;;  %s427_s9 = sphi %s468_s9, %s590_s9  }
   0x5   : > { %s27_s17 = sadd.s32 1, %s443_s13  ;;  %s90_s18 = sadd.s32 1, %s435_s11 }
   0x6   : > { %p29_p0 = scmp.ge.s32.totalorder %s27_s17, 2  ;;  %p100_p1 = scmp.ne.s32.totalorder %s435_s11, %s431_s10 }
   0x7   : > { %p101_p2 = scmp.eq.s32.totalorder %s299_s15, 1  ;;  %p106_p3 = scmp.ne.s32.totalorder %s431_s10, %s427_s9 }
   0x8   : > { %s596_s17 = smov (%p29_p0, %s27_s17), 0  ;;  %p107_p5 = scmp.eq.s32.totalorder %s300_s16, 1 }
   0x9   : > { %p508_p4 = por %p101_p2, %p100_p1  ;;  %s85_s20 = ssub.s32 %s443_s13, %s596_s17 }
   0xa   : > { %p303_p6 = scmp.ge.s32.totalorder %s447_s14, 1  ;;  %p88_p7 = scmp.eq.s32.totalorder %s85_s20, 0 }
   0xb   : > { %p515_p8 = por %p107_p5, %p106_p3  ;;  %p142_p9 = scmp.lt.s32.totalorder %s447_s14, 3 }
   0xc   : > { %s521_s22 = scalar_select %p88_p7, %s435_s11, %s90_s18  }
   0xd   : > { %p143_p10 = pnand %p303_p6, %p142_p9 }
   0xe   : > { %p177_p11 = scmp.lt.s32.totalorder (!%p143_p10), %s439_s12, 624  ;;  %s449_s28 = smov (!%p143_p10), 32   ;;  %vm192_vm0 = vcmask (!%p143_p10), 261120   ;;  %vm194_vm1 = vcmask (!%p143_p10), 523264   ;;  %vm196_vm2 = vcmask (!%p143_p10), 785408  }
   0xf   : > { %146 = sbr.rel (%p143_p10) target bundleno = 164 (0xa4), region = 28  ;;  %s450_s29 = smov (!%p143_p10), 96  }
  0x10   : > { %s451_s30 = smov (!%p143_p10), 64   ;;  %p170_p12 = scmp.lt.s32.totalorder (!%p143_p10), %s439_s12, 1 }
  0x11   : > { %s167_s4 = sand.u32 (!%p143_p10), 1, %s431_s10   ;;  %s308_s16 = sshll.u32 (!%p143_p10), %s439_s12, 7 }
  0x12   : > { %s304_s6 = sshll.u32 (!%p143_p10), %s167_s4, 3  ;;  %s538_s25 = scalar_lea.hbm (!%p143_p10), %s587_s2, %s308_s16 }
  0x13   : > { %s169_s18 = scalar_lea.vmem (!%p143_p10), [#allocation2], %s304_s6  ;;  %s202_s26 = scalar_lea.sflag (!%p143_p10), [#allocation3], %s167_s4 }
  0x14   : > { %s216_s20 = sshll.u32 (!%p143_p10), %s169_s18, 4  ;;  %s540_s20 = int_to_ptr.vmem [resolvable:$true] %s216_s20 }
  0x16   : > { %s178_s23 = scalar_select %p177_p11, %s439_s12, 624 }
  0x17   : > { %s171_s3 = scalar_select %p170_p12, %s439_s12, 1 }
  0x18   : > { %s306_s24 = sshll.u32 %s178_s23, 3  ;;  %s452_s12 = smov [#allocation2]  }
  0x19   : > { %s180_s27 = scalar_lea.vmem %s586_s1, %s306_s24  ;;  %s305_s5 = sshll.u32 %s171_s3, 3 }
  0x1a   : > { %v181_v0 = vld [vmem:[%s180_s27] sm:$0xff]  ;;  %s176_s15 = scalar_lea.vmem %s585_s0, %s305_s5  ;;  %s369_s27 = scalar_lea.vmem %s540_s20, 128 }
  0x1b   : > { %183 = vrot.lane.b32.xlu0 %v181_v0, %s449_s28  ;;  %189 = vrot.lane.b32.xlu1 %v181_v0, %s450_s29  ;;  %v198_v5 = vld [vmem:[%s176_s15] sm:$0xff]  ;;  %p370_p13 = scmp.ne.s32.totalorder %s540_s20, %s369_s27  ;;  %s373_s28 = sshll.u32 %s452_s12, 4  ;;  %s374_s28 = int_to_ptr.vmem [resolvable:$false] %s373_s28 }
  0x1c   : > { %s375_s29 = scalar_lea.vmem %s374_s28, 256  ;;  %p376_p2 = scmp.lt.s32.totalorder %s540_s20, %s374_s28 }
  0x1d   : > { %p371_p0 = pnand %p370_p13, %p508_p4  ;;  %p377_p3 = scmp.lt.s32.totalorder %s375_s29, %s369_s27 }
  0x1f   : > { %186 = vrot.lane.b32.xlu0 %v181_v0, %s451_s30  ;;  %p372_p1 = pneg %p371_p0  ;;  %p378_p5 = por %p377_p3, %p376_p2 }
  0x21   : > { %p379_p6 = pnand %p378_p5, %p372_p1 }
  0x8d   : > { %v184_v1 = vpop.permute.xlu0 %183  ;;  %v190_v2 = vpop.permute.xlu1 %189 }
  0x8e   : > { %v193_v3 = vsel %vm192_vm0, %v181_v0, %v184_v1 }
  0x91   : > { %v187_v4 = vpop.permute.xlu0 %186 }
  0x92   : > { %v195_v6 = vsel %vm194_vm1, %v193_v3, %v187_v4 }
  0x93   : > { %v197_v7 = vsel %vm196_vm2, %v195_v6, %v190_v2 }
  0x94   : > { %v199_v8 = vadd.f32 %v198_v5, %v197_v7 }
  0x96   : > { %200 = vst [vmem:[%s169_s18] sm:$0xff] %v199_v8 }
  0x97   : > { %382 = shalt.err (!%p379_p6)
}
  0x98   : > { %s383_s30 = scalar_lea.hbm %s538_s25, 128  ;;  %s387_s5 = scalar_lea.hbm %s587_s2, 256 }
  0x99   : > { %p384_p7 = scmp.ne.s32.totalorder %s538_s25, %s383_s30  ;;  %p388_p11 = scmp.lt.u32.totalorder %s538_s25, %s587_s2 }
  0x9a   : > { %p389_p12 = scmp.lt.u32.totalorder %s387_s5, %s383_s30  ;;  %p391_p0 = scmp.lt.u32.totalorder %s383_s30, %s538_s25 }
  0x9b   : > { %p385_p9 = pnand %p384_p7, %p508_p4 }
  0x9c   : > { %p390_p13 = por %p389_p12, %p388_p11 }
  0x9d   : > { %p386_p10 = pneg %p385_p9 }
  0x9e   : > { %p392_p1 = por %p391_p0, %p390_p13 }
  0xa0   : > { %p393_p2 = pnand %p392_p1, %p386_p10 }
  0xa2   : > { %396 = shalt.err (!%p393_p2)
}
  0xa3   : > { %311 = dma.vmem_to_hbm [thread:$0]  (%p508_p4), %s540_s20, 128, %s538_s25, %s202_s26  }
  0xa4 PF: > { %p317_p3 = scmp.ge.s32.totalorder %s447_s14, 2  ;;  %s228_s8 = sand.u32 1, %s427_s9  }
  0xa5   : > { %s229_s15 = scalar_lea.sflag [#allocation3], %s228_s8 }
  0xa6   : > { %p314_p5 = pnand %p317_p3, %p515_p8 }
  0xa8   : > { %422 = dma.done.wait (!%p314_p5), %s229_s15, 128  }
  0xa9   : > { %424 = vsyncadd (!%p314_p5), %s229_s15, 4294967168  ;;  %s15_s14 = sadd.s32 1, %s447_s14   ;;  %s590_s9 = smov %s431_s10 }
  0xaa   : > { %p12_p6 = scmp.ge.s32.totalorder %s15_s14, 4   ;;  %s591_s10 = smov %s435_s11 }
  0xab   : > { %s592_s11 = smov %s521_s22  ;;  %s593_s12 = smov %s443_s13 }
  0xac   : > { %s594_s13 = smov %s596_s17  ;;  %14 = sbr.rel (!%p12_p6) target bundleno = 4 (0x4), region = 66 }
  0xb3   :  { %234 = vsyncpa [#allocation3], 1 }
  0xb4   :  { %236 = vsyncpa [#allocation3 + $0x1], 1 }

</bundles_post_ra>
